<compile_context>
chip_gen: v5e
topology: v5e:2x2
jax: 0.10.0
libtpu: 0.0.40
codegen_flags: <defaults>
</compile_context>

<pallas_src>
import functools

import jax
import jax.numpy as jnp
from jax.experimental import pallas as pl
from jax.experimental.pallas import tpu as pltpu


def _round_up(x, m):
    return ((x + m - 1) // m) * m


def _vmem_budget_bytes():
    """Per-generation VMEM budget with ~20% headroom for compiler scratch,
    semaphores, and internal copies."""
    cap = None
    try:
        info = pltpu.get_tpu_info()
        cap = getattr(info, "vmem_capacity_bytes", None)
    except Exception:
        cap = None
    if not cap:
        cap = 64 * 1024 * 1024  # conservative fallback: smallest per-TC VMEM (v7x)
    return int(cap * 0.8)


def _block_spec(shape, index_map, buffers=None):
    """BlockSpec with an optional explicit pipeline buffer count.

    Falls back to the default double-buffered spec if the installed JAX does
    not accept pipeline_mode."""
    if buffers is not None and hasattr(pl, "Buffered"):
        try:
            return pl.BlockSpec(shape, index_map, pipeline_mode=pl.Buffered(buffers))
        except TypeError:
            pass
    return pl.BlockSpec(shape, index_map)


# --------------------------------------------------------------------------
# Kernels
# --------------------------------------------------------------------------
def _resident_kernel(x_ref, w_ref, b_ref, o_ref, *, use_bf16):
    # x_ref: (TM, H)  w_ref: (H, H)  b_ref: (1, H)  o_ref: (TM, H)
    x = x_ref[...]
    if use_bf16:
        y = jnp.dot(x.astype(jnp.bfloat16), w_ref[...].astype(jnp.bfloat16),
                    preferred_element_type=jnp.float32)
    else:
        y = jnp.dot(x, w_ref[...], preferred_element_type=jnp.float32)
    # Fused epilogue: bias + residual in f32, single cast, single store.
    o_ref[...] = (y + b_ref[...].astype(jnp.float32)
                  + x.astype(jnp.float32)).astype(o_ref.dtype)


def _ntiled_kernel(x_ref, w_ref, b_ref, o_ref, *, tn, use_bf16):
    # x_ref: (TM, Hp) resident across the N axis
    # w_ref: (Hp, TN) column tile of the weight
    # b_ref: (1, TN)  o_ref: (TM, TN)
    j = pl.program_id(1)
    x = x_ref[...]
    if use_bf16:
        y = jnp.dot(x.astype(jnp.bfloat16), w_ref[...].astype(jnp.bfloat16),
                    preferred_element_type=jnp.float32)
    else:
        y = jnp.dot(x, w_ref[...], preferred_element_type=jnp.float32)
    off = pl.multiple_of(j * tn, 128)
    res = x_ref[:, pl.ds(off, tn)]          # residual slice for this N tile
    o_ref[...] = (y + b_ref[...].astype(jnp.float32)
                  + res.astype(jnp.float32)).astype(o_ref.dtype)


# --------------------------------------------------------------------------
# Wrapper
# --------------------------------------------------------------------------
def residual_add_linear(x, w, b, *, use_bf16_matmul=False):
    """out = (x @ w + b) + x  with x of shape (B, S, H)."""
    B, S, H = x.shape
    M = B * S
    isz = jnp.dtype(x.dtype).itemsize
    budget = _vmem_budget_bytes()

    x2 = x.reshape(M, H)
    m_full = _round_up(M, 8)

    # ---------- Path A: weight fully resident (single-buffered). ----------
    # VMEM need: w + b (1 buffer each) + 2 pipeline buffers x (x + out) tiles.
    w_bytes = (H * H + H) * isz
    avail_a = budget - w_bytes
    tm_a = (avail_a // (4 * H * isz)) if avail_a > 0 else 0
    tm_a = (tm_a // 8) * 8

    if tm_a >= min(128, m_full):
        # Size the row tile from the budget; keep >= 2 tiles so both v7x
        # TensorCores (megacore) get work.
        tm = min(tm_a, m_full, 2048)
        if tm >= 512:
            tm = (tm // 256) * 256
        if M > 8 and pl.cdiv(M, tm) < 2:
            tm = _round_up(pl.cdiv(M, 2), 8)
        grid = (pl.cdiv(M, tm),)

        cost = pl.CostEstimate(
            flops=2 * M * H * H,
            bytes_accessed=(2 * M * H + H * H + H) * isz,
            transcendentals=0,
        )
        out2 = pl.pallas_call(
            functools.partial(_resident_kernel, use_bf16=use_bf16_matmul),
            out_shape=jax.ShapeDtypeStruct((M, H), x.dtype),
            grid=grid,
            in_specs=[
                _block_spec((tm, H), lambda i: (i, 0)),             # x: row tiles
                _block_spec((H, H), lambda i: (0, 0), buffers=1),   # w: resident, 1 buf
                _block_spec((1, H), lambda i: (0, 0), buffers=1),   # b: resident, 1 buf
            ],
            out_specs=pl.BlockSpec((tm, H), lambda i: (i, 0)),
            compiler_params=pltpu.CompilerParams(
                dimension_semantics=("parallel",),
                vmem_limit_bytes=budget,
            ),
            cost_estimate=cost,
        )(x2, w, b.reshape(1, H))
        return out2.reshape(B, S, H)

    # ---------- Path B: weight too big -> N-tile weight / output. ----------
    # x row tile stays resident across the N axis (index_map returns (i, 0)),
    # so K is un-split and no f32 accumulator scratch is needed.
    Hp = _round_up(H, 128)
    pad = Hp - H
    tn = 512 if Hp % 512 == 0 else (256 if Hp % 256 == 0 else 128)

    x2p = jnp.pad(x2, ((0, 0), (0, pad))) if pad else x2
    w_p = jnp.pad(w, ((0, pad), (0, pad))) if pad else w
    b_p = (jnp.pad(b, ((0, pad),)) if pad else b).reshape(1, Hp)

    # VMEM: 2*tm*Hp (x) + 2*Hp*tn (w tiles) + 2*tm*tn (out) + 2*tn (bias).
    denom = 2 * (Hp + tn) * isz
    tm_b = (budget - 2 * Hp * tn * isz - 2 * tn * isz) // denom
    tm_b = max(8, (tm_b // 8) * 8)
    tm = min(tm_b, m_full)
    if tm >= 512:
        tm = (tm // 256) * 256
    if M > 8 and pl.cdiv(M, tm) < 2:
        tm = _round_up(pl.cdiv(M, 2), 8)
    # TODO(synk): if even the (tm, Hp) x tile does not fit (extreme H), fall
    # back to K-tiling with an f32 VMEM accumulator + pl.when init/finalize.

    grid = (pl.cdiv(M, tm), Hp // tn)
    cost = pl.CostEstimate(
        flops=2 * M * Hp * Hp,
        bytes_accessed=(2 * M * Hp + Hp * Hp + Hp) * isz,
        transcendentals=0,
    )
    out2 = pl.pallas_call(
        functools.partial(_ntiled_kernel, tn=tn, use_bf16=use_bf16_matmul),
        out_shape=jax.ShapeDtypeStruct((M, Hp), x.dtype),
        grid=grid,
        in_specs=[
            _block_spec((tm, Hp), lambda i, j: (i, 0)),   # x: resident across N
            _block_spec((Hp, tn), lambda i, j: (0, j)),   # weight column tile
            _block_spec((1, tn), lambda i, j: (0, j)),    # bias tile
        ],
        out_specs=pl.BlockSpec((tm, tn), lambda i, j: (i, j)),
        compiler_params=pltpu.CompilerParams(
            dimension_semantics=("parallel", "arbitrary"),
            vmem_limit_bytes=budget,
        ),
        cost_estimate=cost,
    )(x2p, w_p, b_p)
    if pad:
        out2 = out2[:, :H]
    return out2.reshape(B, S, H)


if __name__ == "__main__":
    key = jax.random.PRNGKey(0)
    kx, kw, kb = jax.random.split(key, 3)

    batch, seq, hidden = 2, 8, 32
    x = jax.random.normal(kx, (batch, seq, hidden), dtype=jnp.float32)

    # Deterministic synthetic parameters for the inner fn = Linear(hidden, hidden)
    # (mimics PyTorch nn.Linear's uniform(-1/sqrt(H), 1/sqrt(H)) init).
    bound = 1.0 / (hidden ** 0.5)
    w = jax.random.uniform(kw, (hidden, hidden), jnp.float32, -bound, bound)
    b = jax.random.uniform(kb, (hidden,), jnp.float32, -bound, bound)

    out = residual_add_linear(x, w, b)
    out = jax.block_until_ready(out)

    # Reference check in plain JAX: fn(x) + x
    ref = jnp.einsum("bsh,hk->bsk", x, w) + b + x
    assert out.shape == x.shape
    assert jnp.allclose(out, ref, atol=1e-5, rtol=1e-5)

    print("KERNEL_OK")
</pallas_src>

<mosaic_0001>
module attributes {stable_mosaic.version = 11 : i64} {
  func.func @_resident_kernel(%arg0: i32, %arg1: memref<8x32xf32, #tpu.memory_space<vmem>>, %arg2: memref<32x32xf32, #tpu.memory_space<vmem>>, %arg3: memref<1x32xf32, #tpu.memory_space<vmem>>, %arg4: memref<8x32xf32, #tpu.memory_space<vmem>>) attributes {dimension_semantics = [#tpu.dimension_semantics<parallel>], iteration_bounds = array<i64: 2>, scalar_prefetch = 0 : i64, scratch_operands = 0 : i64, tpu.core_type = #tpu.core_type<tc>, window_params = [{transform_indices = @transform_0, window_bounds = array<i64: 8, 32>}, {pipeline_mode = #tpu.pipeline_mode<synchronous>, transform_indices = @transform_1, window_bounds = array<i64: 32, 32>}, {pipeline_mode = #tpu.pipeline_mode<synchronous>, transform_indices = @transform_2, window_bounds = array<i64: 1, 32>}, {transform_indices = @transform_3, window_bounds = array<i64: 8, 32>}]} {
    %c0 = arith.constant 0 : index
    %c0_0 = arith.constant 0 : index
    %0 = vector.load %arg1[%c0, %c0_0] : memref<8x32xf32, #tpu.memory_space<vmem>>, vector<8x32xf32>
    %c0_1 = arith.constant 0 : index
    %c0_2 = arith.constant 0 : index
    %1 = vector.load %arg2[%c0_1, %c0_2] : memref<32x32xf32, #tpu.memory_space<vmem>>, vector<32x32xf32>
    %cst = arith.constant dense<0.000000e+00> : vector<8x32xf32>
    %2 = tpu.matmul %0, %1, %cst {dimension_numbers = #tpu.dot_dimension_numbers<[1], [0], [0], [1], [0, 0, 1, 1], [], []>} : vector<8x32xf32>, vector<32x32xf32>, vector<8x32xf32> -> vector<8x32xf32>
    %c0_3 = arith.constant 0 : index
    %c0_4 = arith.constant 0 : index
    %3 = vector.load %arg3[%c0_3, %c0_4] : memref<1x32xf32, #tpu.memory_space<vmem>>, vector<1x32xf32>
    %4 = vector.broadcast %3 : vector<1x32xf32> to vector<8x32xf32>
    %5 = arith.addf %2, %4 : vector<8x32xf32>
    %6 = arith.addf %5, %0 : vector<8x32xf32>
    %c0_5 = arith.constant 0 : index
    %c0_6 = arith.constant 0 : index
    %7 = vector.load %arg4[%c0_5, %c0_6] : memref<8x32xf32, #tpu.memory_space<vmem>>, vector<8x32xf32>
    tpu.vector_store %arg4[%c0_5, %c0_6], %6 {strides = array<i32>} : memref<8x32xf32, #tpu.memory_space<vmem>>, vector<8x32xf32>,
    return
  }
  func.func @transform_0(%arg0: i32) -> (i32, i32) {
    %c0_i32 = arith.constant 0 : i32
    %c0_i32_0 = arith.constant 0 : i32
    return %arg0, %c0_i32 : i32, i32
  }
  func.func @transform_1(%arg0: i32) -> (i32, i32) {
    %c0_i32 = arith.constant 0 : i32
    %c0_i32_0 = arith.constant 0 : i32
    %c0_i32_1 = arith.constant 0 : i32
    return %c0_i32, %c0_i32_0 : i32, i32
  }
  func.func @transform_2(%arg0: i32) -> (i32, i32) {
    %c0_i32 = arith.constant 0 : i32
    %c0_i32_0 = arith.constant 0 : i32
    %c0_i32_1 = arith.constant 0 : i32
    return %c0_i32, %c0_i32_0 : i32, i32
  }
  func.func @transform_3(%arg0: i32) -> (i32, i32) {
    %c0_i32 = arith.constant 0 : i32
    %c0_i32_0 = arith.constant 0 : i32
    return %arg0, %c0_i32 : i32, i32
  }
}

</mosaic_0001>

<bundles_post_ra>
// kernel: tpu_custom_call.1
= control target key start
LH: loop header
LB: loop body
LE: loop exit
PB: predicated region body
PF: predicated region fallthrough
CT: control target
= control target key end

     0   :  { %8 = vsyncpa [#allocation3], 0  ;;  %s705_s0 = inlined_call_operand.hbm [shape: f32[16,32], index: 0, kind: input, shape index: {}]   ;;  %s706_s1 = inlined_call_operand.hbm [shape: f32[32,32], index: 1, kind: input, shape index: {}]   ;;  %s707_s2 = inlined_call_operand.vmem [shape: f32[1,32], index: 2, kind: input, shape index: {}]   ;;  %s708_s3 = inlined_call_operand.hbm [shape: f32[16,32], index: 3, kind: output, shape index: {}]  }
   0x1   :  { %10 = vsyncpa [#allocation3 + $0x1], 0 }
   0x2   :  { %11 = vsyncpa [#allocation6], 0 }
   0x3   :  { %12 = vsyncpa [#allocation4], 0 }
   0x4   :  { %14 = vsyncpa [#allocation4 + $0x1], 0  ;;  %s566_s12 = smov 0   ;;  %s568_s13 = smov 0  }
   0x5   :  { %s570_s14 = smov 0   ;;  %s572_s15 = smov 0  }
   0x6 LB: > { %s130_s18 = sshll.u32 %s706_s1, 4  ;;  %s590_s19 = sadd.s32 4294967295, %s541_s15   ;;  %s541_s15 = sphi %s572_s15, %s718_s15   ;;  %s537_s14 = sphi %s570_s14, %s717_s14   ;;  %s533_s13 = sphi %s568_s13, %s716_s13   ;;  %s529_s12 = sphi %s566_s12, %s715_s12   ;;  %s131_s18 = int_to_ptr.hbm [resolvable:$true] %s130_s18 }
   0x7   : > { %p337_p0 = scmp.ge.s32.totalorder %s541_s15, 1  ;;  %p41_p1 = scmp.eq.s32.totalorder %s590_s19, 0 }
   0x8   : > { %p119_p2 = scmp.lt.s32.totalorder %s541_s15, 3  ;;  %s543_s21 = smov [#allocation5]  }
   0x9   : > { %s132_s22 = sshll.u32 %s543_s21, 4  ;;  %s544_s23 = smov 128   ;;  %s133_s22 = int_to_ptr.vmem [resolvable:$true] %s132_s22 }
   0xa   : > { %p595_p3 = pnand %p337_p0, %p119_p2  ;;  %s545_s24 = smov 8  }
   0xb   : > { %s336_s25 = sadd.s32 4294967294, %s541_s15   ;;  %s606_s26 = sadd.s32 1, %s541_s15  }
   0xc   : > { %p359_p4 = pneg %p595_p3  ;;  %s27_s27 = sadd.s32 1, %s537_s14 }
   0xd   : > { %s24_s28 = ssub.s32 %s541_s15, %s606_s26  ;;  %p34_p7 = scmp.ne.s32.totalorder %s537_s14, %s533_s13 }
   0xe   : > { %p360_p6 = pnand %p359_p4, %p41_p1  ;;  %p25_p8 = scmp.eq.s32.totalorder %s24_s28, 0 }
   0xf   : > { %p35_p9 = scmp.eq.s32.totalorder %s541_s15, 0  ;;  %p40_p10 = scmp.ne.s32.totalorder %s533_s13, %s529_s12 }
  0x10   : > { %362 = dma.hbm_to_vmem [thread:$0]  (!%p360_p6), %s131_s18, 512, %s133_s22, [#allocation6], %s544_s23, %s544_s23, %s545_s24  }
  0x11   : > { %p106_p11 = scmp.eq.s32.totalorder %s590_s19, 1  ;;  %p622_p12 = por %p41_p1, %p40_p10 }
  0x12   : > { %s618_s29 = scalar_select %p25_p8, %s537_s14, %s27_s27  }
  0x13   : > { %p626_p13 = por %p106_p11, %p34_p7  ;;  %p112_p0 = scmp.eq.s32.totalorder %s336_s25, 1 }
  0x14   : > { %p36_p2 = por %p35_p9, %p34_p7  ;;  %s149_s5 = sand.u32 1, %s537_s14  }
  0x15   : > { %p631_p4 = por %p112_p0, %p40_p10  ;;  %p372_p6 = scmp.lt.s32.totalorder %s541_s15, 2 }
  0x16   : > { %s340_s7 = sshll.u32 %s149_s5, 3  ;;  %s341_s8 = sshll.u32 %s541_s15, 3 }
  0x17   : > { %s157_s11 = scalar_lea.hbm %s705_s0, %s341_s8  ;;  %s153_s17 = scalar_lea.vmem [#allocation2], %s340_s7 }
  0x18   : > { %s159_s16 = sshll.u32 %s157_s11, 4  ;;  %s161_s18 = sshll.u32 %s153_s17, 4  ;;  %s160_s16 = int_to_ptr.hbm [resolvable:$true] %s159_s16  ;;  %s162_s18 = int_to_ptr.vmem [resolvable:$true] %s161_s18 }
  0x19   : > { %p640_p8 = pnand %p372_p6, %p36_p2  ;;  %s150_s22 = scalar_lea.sflag [#allocation3], %s149_s5 }
  0x1a   : > { %s441_s23 = sshra.s32 %s160_s16, 4  ;;  %s448_s28 = scalar_lea.hbm %s705_s0, 16  ;;  %s442_s23 = int_to_ptr.hbm [resolvable:$true] %s441_s23 }
  0x1b   : > { %s443_s24 = scalar_lea.hbm %s442_s23, 8  ;;  %p445_p9 = pneg %p640_p8 }
  0x1c   : > { %p444_p7 = scmp.ne.s32.totalorder %s442_s23, %s443_s24  ;;  %p449_p0 = scmp.lt.s32.totalorder %s442_s23, %s705_s0 }
  0x1d   : > { %p450_p2 = scmp.lt.s32.totalorder %s448_s28, %s443_s24 }
  0x1e   : > { %p446_p10 = pnand %p445_p9, %p444_p7 }
  0x1f   : > { %p451_p6 = por %p450_p2, %p449_p0 }
  0x20   : > { %p447_p11 = pneg %p446_p10 }
  0x22   : > { %p452_p5 = pnand %p451_p6, %p447_p11 }
  0x24   : > { %455 = shalt.err (!%p452_p5)
}
  0x25   : > { %366 = dma.hbm_to_vmem [thread:$0]  (!%p640_p8), %s160_s16, 128, %s162_s18, %s150_s22  }
  0x26   : > { %170 = sbr.rel (%p595_p3) target bundleno = 187 (0xbb), region = 32  ;;  %s657_s5 = sand.u32 (!%p595_p3), 1, %s533_s13  }
  0x27   : > { %s343_s9 = sshll.u32 (!%p595_p3), %s657_s5, 3  ;;  %s173_s10 = scalar_lea.sflag (!%p595_p3), [#allocation3], %s657_s5 }
  0x28   : > { %s176_s11 = scalar_lea.vmem (!%p595_p3), [#allocation2], %s343_s9 }
  0x2b   : > { %516 = dma.done.wait (%p622_p12), %s173_s10, 128  }
  0x2c   : > { %518 = vsyncadd (%p622_p12), %s173_s10, 4294967168 }
  0x2d   : > { %520 = dma.done.wait (%p41_p1), [#allocation6], 512  }
  0x2e   : > { %522 = vsyncadd (%p41_p1), [#allocation6], 4294966784  ;;  %v209_v0 = vld [vmem:[#allocation5 + $0x18] sm:$0xff]  ;;  %v208_v1 = vld [vmem:[#allocation5 + $0x10] sm:$0xff]  ;;  %vm214_vm0 = vcmask 261120   ;;  %s348_s20 = sshll.u32 %s590_s19, 3 }
  0x2f   : > { %230 = vmatpush.msra.mxu0 %v209_v0  ;;  %v207_v2 = vld [vmem:[#allocation5 + $0x8] sm:$0xff]  ;;  %v206_v3 = vld [vmem:[#allocation5] sm:$0xff]  ;;  %v205_v4 = vld [vmem:[%s176_s11] sm:$0xff]  ;;  %s251_s21 = scalar_lea.hbm %s708_s3, %s348_s20  ;;  %s204_s22 = scalar_lea.vmem [#allocation7], %s343_s9 }
  0x30   : > { %v410_v5 = vld [vmem:[%s707_s2] ss:$0 sm:$0xff]  ;;  %s253_s23 = sshll.u32 %s204_s22, 4  ;;  %s255_s24 = sshll.u32 %s251_s21, 4  ;;  %s254_s23 = int_to_ptr.vmem [resolvable:$true] %s253_s23  ;;  %s256_s24 = int_to_ptr.hbm [resolvable:$true] %s255_s24 }
  0x31   : > { %231 = vmatpush.msra.mxu0 %v208_v1  ;;  %s241_s25 = scalar_lea.sflag [#allocation4], %s657_s5  ;;  %s485_s19 = sshra.s32 %s256_s24, 4  ;;  %s486_s19 = int_to_ptr.hbm [resolvable:$true] %s485_s19 }
  0x32   : > { %s487_s27 = scalar_lea.hbm %s486_s19, 8  ;;  %s491_s8 = scalar_lea.hbm %s708_s3, 16 }
  0x33   : > { %232 = vmatpush.msra.mxu0 %v207_v2  ;;  %p488_p1 = scmp.ne.s32.totalorder %s486_s19, %s487_s27  ;;  %p492_p12 = scmp.lt.s32.totalorder %s486_s19, %s708_s3 }
  0x34   : > { %p493_p8 = scmp.lt.s32.totalorder %s491_s8, %s487_s27 }
  0x35   : > { %233 = vmatpush.msra.mxu0 %v206_v3  ;;  %p489_p3 = pnand %p488_p1, %p626_p13 }
  0x36   : > { %346 = vmatmul.msk.f32.vlgmr.msra.gmra.mxu0 %vm214_vm0, %v205_v4  ;;  %p494_p7 = por %p493_p8, %p492_p12 }
  0x37   : > { %p490_p5 = pneg %p489_p3 }
  0x39   : > { %p495_p9 = pnand %p494_p7, %p490_p5 }
  0xb3   : > { %v235_v6 = vpop.f32.mrf.mxu0 }
  0xb4   : > { %v236_v7 = vadd.f32 %v410_v5, %v235_v6 }
  0xb6   : > { %v238_v8 = vadd.f32 %v236_v7, %v205_v4 }
  0xb8   : > { %239 = vst.msk [vmem:[%s204_s22] sm:$0xff] %vm214_vm0, %v238_v8 }
  0xb9   : > { %498 = shalt.err (!%p495_p9)
}
  0xba   : > { %357 = dma.vmem_to_hbm [thread:$0]  (%p626_p13), %s254_s23, 128, %s256_s24, %s241_s25  }
  0xbb PF: > { %s267_s5 = sand.u32 1, %s529_s12   ;;  %p714_p10 = scmp.ge.s32.totalorder %s541_s15, 2 }
  0xbc   : > { %s268_s11 = scalar_lea.sflag [#allocation4], %s267_s5 }
  0xbd   : > { %p368_p11 = pnand %p714_p10, %p631_p4 }
  0xbf   : > { %p369_p0 = pneg %p368_p11 }
  0xc1   : > { %524 = dma.done.wait (%p369_p0), %s268_s11, 128  }
  0xc2   : > { %526 = vsyncadd (%p369_p0), %s268_s11, 4294967168  ;;  %p17_p2 = scmp.ge.s32.totalorder %s606_s26, 4   ;;  %s715_s12 = smov %s533_s13 }
  0xc3   : > { %s716_s13 = smov %s537_s14  ;;  %s717_s14 = smov %s618_s29 }
  0xc4   : > { %s718_s15 = smov %s606_s26  ;;  %19 = sbr.rel (!%p17_p2) target bundleno = 6 (0x6), region = 81 }
  0xc9   :  { %274 = vsyncpa [#allocation3], 1 }
  0xca   :  { %276 = vsyncpa [#allocation3 + $0x1], 1 }
  0xcb   :  { %277 = vsyncpa [#allocation6], 1 }
  0xcc   :  { %278 = vsyncpa [#allocation4], 1 }
  0xcd   :  { %280 = vsyncpa [#allocation4 + $0x1], 1 }

</bundles_post_ra>
